<compile_context>
chip_gen: v7x
topology: tpu7x:2x2x1
jax: 0.10.0
libtpu: 0.0.40
codegen_flags: <defaults>
</compile_context>

<pallas_src>
import jax
import jax.numpy as jnp
from jax.experimental import pallas as pl
from jax.experimental.pallas import tpu as pltpu

# Per-tile byte budget.  4 live tile buffers (in + out, double-buffered) at
# this size stay under ~16 MiB, comfortably inside v7x's 32 MiB scoped-VMEM
# default (and trivially inside v5e/v6e's 128 MiB).
_TILE_BYTE_BUDGET = 4 * 1024 * 1024


def _identity_logit_kernel(x_ref, o_ref):
    # The entire "forward" of the base Model: emit a logit tensor.  With no
    # defined computation, logit == input features.
    o_ref[...] = x_ref[...]


def _sublane_tile(dtype) -> int:
    """Minimum row granularity for the given dtype (sublane packing)."""
    itemsize = jnp.dtype(dtype).itemsize
    # 8 rows for 4-byte dtypes, 16 for 2-byte (bf16), 32 for 1-byte (int8).
    return max(8, 32 // max(itemsize, 1))


def _choose_block_rows(B: int, F: int, dtype) -> int:
    """Largest row-tile that (a) fits the VMEM budget, (b) respects the
    dtype sublane tile, (c) collapses to a single block when possible."""
    itemsize = jnp.dtype(dtype).itemsize
    sub = _sublane_tile(dtype)
    row_bytes = max(F * itemsize, 1)
    max_rows = max(sub, (_TILE_BYTE_BUDGET // row_bytes) // sub * sub)
    if B <= max_rows:
        return B  # single block: block_shape == full array, grid=(1,)
    return max_rows


def model_forward(x: jax.Array, *, block_rows: int | None = None) -> jax.Array:
    """Pallas-backed Model.forward stand-in.

    Args:
        x: (B, F) batch features (any dtype).
        block_rows: optional override of the row tile (rounded up to the
            dtype's sublane tile); by default chosen from the VMEM budget.
    Returns:
        logit: (B, F), identical to x (base class defines no math).  The
        output aliases the input, so a donating caller pays no HBM traffic.
    """
    B, F = x.shape
    if block_rows is None:
        block_rows = _choose_block_rows(B, F, x.dtype)
    else:
        sub = _sublane_tile(x.dtype)
        block_rows = min(B, max(sub, ((block_rows + sub - 1) // sub) * sub))

    grid = (pl.cdiv(B, block_rows),)
    return pl.pallas_call(
        _identity_logit_kernel,
        out_shape=jax.ShapeDtypeStruct((B, F), x.dtype),
        grid=grid,
        # Last block dim is the full (lane-dense) feature width F.
        in_specs=[pl.BlockSpec((block_rows, F), lambda i: (i, 0))],
        out_specs=pl.BlockSpec((block_rows, F), lambda i: (i, 0)),
        input_output_aliases={0: 0},
        compiler_params=pltpu.CompilerParams(
            dimension_semantics=("parallel",)
        ),
    )(x)


class Model:
    """JAX/Pallas mirror of the abstract PyTorch base Model."""

    def __init__(self, config=None, meta=None):
        # Base class registers no parameters.
        pass

    def initialize(self, config=None, meta=None):
        # "Initialize GloVe or whatever." — no-op in the base class.
        pass

    def forward(self, batch: jax.Array) -> jax.Array:
        return model_forward(batch)

    def get_loss(self, logit, batch):
        # TODO(synk): abstract in the base class; subclasses define it.
        raise NotImplementedError

    def get_pred(self, logit, batch):
        # TODO(synk): abstract in the base class; subclasses define it.
        raise NotImplementedError


if __name__ == "__main__":
    key = jax.random.PRNGKey(0)

    model = Model(config=None, meta=None)
    model.initialize(config=None, meta=None)

    # Case 1: toy (8, 128) f32 batch — collapses to a single block, grid=(1,).
    x = jax.random.normal(key, (8, 128), dtype=jnp.float32)
    logit = model.forward(x)
    jax.block_until_ready(logit)
    assert logit.shape == x.shape and logit.dtype == x.dtype
    assert bool(jnp.allclose(logit, x))

    # Case 2: force a multi-block grid to exercise the tiled/aliased path.
    k2 = jax.random.fold_in(key, 1)
    x2 = jax.random.normal(k2, (32, 128), dtype=jnp.float32)
    logit2 = model_forward(x2, block_rows=8)  # grid=(4,)
    jax.block_until_ready(logit2)
    assert bool(jnp.allclose(logit2, x2))

    # Case 3: bf16 input — block rows honor the 16-row sublane tile.
    k3 = jax.random.fold_in(key, 2)
    x3 = jax.random.normal(k3, (16, 128), dtype=jnp.bfloat16)
    logit3 = model_forward(x3)
    jax.block_until_ready(logit3)
    assert logit3.dtype == jnp.bfloat16
    assert bool(jnp.all(logit3 == x3))

    print("KERNEL_OK")
</pallas_src>

<mosaic_0001>
module attributes {stable_mosaic.version = 11 : i64} {
  func.func @_identity_logit_kernel(%arg0: i32, %arg1: memref<8x128xf32, #tpu.memory_space<vmem>>, %arg2: memref<8x128xf32, #tpu.memory_space<vmem>>) attributes {dimension_semantics = [#tpu.dimension_semantics<parallel>], iteration_bounds = array<i64: 1>, scalar_prefetch = 0 : i64, scratch_operands = 0 : i64, tpu.core_type = #tpu.core_type<tc>, window_params = [{transform_indices = @transform_0, window_bounds = array<i64: 8, 128>}, {transform_indices = @transform_1, window_bounds = array<i64: 8, 128>}]} {
    %c0 = arith.constant 0 : index
    %c0_0 = arith.constant 0 : index
    %0 = vector.load %arg1[%c0, %c0_0] : memref<8x128xf32, #tpu.memory_space<vmem>>, vector<8x128xf32>
    %c0_1 = arith.constant 0 : index
    %c0_2 = arith.constant 0 : index
    %1 = vector.load %arg2[%c0_1, %c0_2] : memref<8x128xf32, #tpu.memory_space<vmem>>, vector<8x128xf32>
    tpu.vector_store %arg2[%c0_1, %c0_2], %0 {strides = array<i32>} : memref<8x128xf32, #tpu.memory_space<vmem>>, vector<8x128xf32>,
    return
  }
  func.func @transform_0(%arg0: i32) -> (i32, i32) {
    %c0_i32 = arith.constant 0 : i32
    %c0_i32_0 = arith.constant 0 : i32
    return %arg0, %c0_i32 : i32, i32
  }
  func.func @transform_1(%arg0: i32) -> (i32, i32) {
    %c0_i32 = arith.constant 0 : i32
    %c0_i32_0 = arith.constant 0 : i32
    return %arg0, %c0_i32 : i32, i32
  }
}

</mosaic_0001>

<bundles_post_ra>
// kernel: tpu_custom_call.1
= control target key start
LH: loop header
LB: loop body
LE: loop exit
PB: predicated region body
PF: predicated region fallthrough
CT: control target
= control target key end

     0   :  { %6 = vsyncpa [#allocation3], 0  ;;  %s124_s0 = inlined_call_operand.hbm [shape: f32[8,128], index: 0, kind: input, shape index: {}, may-alias: {0,1}]   ;;  %s125_s1 = inlined_call_operand.hbm [shape: f32[8,128], index: 1, kind: output, shape index: {}, may-alias: {0,1}]  }
   0x1   :  { %7 = vsyncpa [#allocation4], 0  ;;  %s88_s6 = smov [#allocation2]   ;;  %s40_s10 = scalar_lea.hbm %s124_s0, 128 }
   0x2   :  { %s14_s7 = sshll.u32 %s88_s6, 4  ;;  %p41_p0 = scmp.ne.s32.totalorder %s124_s0, %s40_s10  ;;  %s15_s7 = int_to_ptr.vmem [resolvable:$true] %s14_s7 }
   0x3   :  { %p44_p1 = scmp.lt.u32.totalorder %s40_s10, %s124_s0 }
   0x5   :  { %p46_p2 = pnand %p44_p1, %p41_p0 }
   0x7   :  { %49 = shalt.err (!%p46_p2)
}
   0x8   :  { %s50_s15 = scalar_lea.vmem %s15_s7, 128  ;;  %p55_p4 = scmp.lt.s32.totalorder %s15_s7, %s15_s7 }
   0x9   :  { %p51_p3 = scmp.ne.s32.totalorder %s15_s7, %s50_s15  ;;  %p56_p5 = scmp.lt.s32.totalorder %s50_s15, %s50_s15 }
   0xb   :  { %p57_p6 = por %p56_p5, %p55_p4 }
   0xd   :  { %p58_p7 = pnand %p57_p6, %p51_p3 }
   0xf   :  { %61 = shalt.err (!%p58_p7)
}
  0x10   :  { %17 = dma.hbm_to_vmem [thread:$0]  %s124_s0, 128, %s15_s7, [#allocation3]  }
  0x11   :  { %84 = dma.done.wait [#allocation3], 128  }
  0x12   :  { %85 = vsyncadd [#allocation3], 4294967168  ;;  %s89_s18 = smov [#allocation5]   ;;  %v21_v0 = vld [vmem:[#allocation2] sm:$0xff] }
  0x13   :  { %s29_s19 = sshll.u32 %s89_s18, 4  ;;  %22 = vst [vmem:[#allocation5] sm:$0xff] %v21_v0  ;;  %s30_s19 = int_to_ptr.vmem [resolvable:$true] %s29_s19 }
  0x14   :  { %s62_s20 = scalar_lea.vmem %s30_s19, 128  ;;  %p67_p9 = scmp.lt.s32.totalorder %s30_s19, %s30_s19 }
  0x15   :  { %p63_p8 = scmp.ne.s32.totalorder %s30_s19, %s62_s20  ;;  %p68_p10 = scmp.lt.s32.totalorder %s62_s20, %s62_s20 }
  0x17   :  { %p69_p11 = por %p68_p10, %p67_p9 }
  0x19   :  { %p70_p12 = pnand %p69_p11, %p63_p8 }
  0x1b   :  { %73 = shalt.err (!%p70_p12)
}
  0x1c   :  { %s74_s23 = scalar_lea.hbm %s125_s1, 128 }
  0x1d   :  { %p75_p13 = scmp.ne.s32.totalorder %s125_s1, %s74_s23  ;;  %p78_p0 = scmp.lt.u32.totalorder %s74_s23, %s125_s1 }
  0x1f   :  { %p80_p1 = pnand %p78_p0, %p75_p13 }
  0x21   :  { %83 = shalt.err (!%p80_p1)
}
  0x22   :  { %32 = dma.vmem_to_hbm [thread:$0]  %s30_s19, 128, %s125_s1, [#allocation4]  }
  0x23   :  { %86 = dma.done.wait [#allocation4], 128  }
  0x24   :  { %87 = vsyncadd [#allocation4], 4294967168 }
  0x25   :  { %36 = vsyncpa [#allocation3], 1 }
  0x26   :  { %37 = vsyncpa [#allocation4], 1 }

</bundles_post_ra>
